<compile_context>
chip_gen: v5e
topology: v5e:2x2
jax: 0.10.0
libtpu: 0.0.40
codegen_flags: <defaults>
</compile_context>

<pallas_src>
import jax
import jax.numpy as jnp
from jax import lax
from jax.experimental import pallas as pl
from jax.experimental.pallas import tpu as pltpu

EPS = 1e-5


# ---------------------------------------------------------------------------
# Kernels (two-pass / centered variance, f32 accumulation)
# ---------------------------------------------------------------------------
def _ln_center(x_f32):
    h = x_f32.shape[-1]
    inv_h = jnp.float32(1.0 / h)
    mean = jnp.sum(x_f32, axis=-1, keepdims=True) * inv_h
    xc = x_f32 - mean
    var = jnp.sum(xc * xc, axis=-1, keepdims=True) * inv_h
    inv = lax.rsqrt(var + jnp.float32(EPS))
    return xc, inv


def _layernorm_bias_kernel(x_ref, w_ref, b_ref, o_ref):
    # x_ref: (tile_rows, H); w_ref/b_ref: (1, H)
    x = x_ref[...].astype(jnp.float32)
    xc, inv = _ln_center(x)
    y = xc * inv * w_ref[...].astype(jnp.float32) + b_ref[...].astype(jnp.float32)
    o_ref[...] = y.astype(o_ref.dtype)


def _layernorm_nobias_kernel(x_ref, w_ref, o_ref):
    x = x_ref[...].astype(jnp.float32)
    xc, inv = _ln_center(x)
    y = xc * inv * w_ref[...].astype(jnp.float32)
    o_ref[...] = y.astype(o_ref.dtype)


# ---------------------------------------------------------------------------
# Tile selection / wrapper
# ---------------------------------------------------------------------------
def _vmem_capacity_bytes():
    try:
        info = pltpu.get_tpu_info()
        cap = getattr(info, "vmem_capacity_bytes", None)
        if cap:
            return int(cap)
    except Exception:
        pass
    return 64 * 1024 * 1024  # v7x-safe floor


def _round_up(a, b):
    return -(-a // b) * b


def _sublane_for_itemsize(itemsize):
    # Rows per packed sublane tile: f32 -> 8, bf16/f16 -> 16, int8/fp8 -> 32.
    if itemsize >= 4:
        return 8
    if itemsize == 2:
        return 16
    return 32


def _pick_row_tile(R, H, in_dsize, out_dsize):
    """Pick a row tile (multiple of the dtype's sublane packing).

    Targets ~4 MiB input blocks on 64 MiB-VMEM parts (v7x) and ~8 MiB on
    128 MiB-VMEM parts (v5e/v6e), capped so the double-buffered in/out
    pipeline buffers PLUS the in-kernel f32 temporaries fit in half of VMEM,
    and clamped so there are >= ~8 grid steps when there is enough work
    (>= ~4 steps per TensorCore on v7x) to keep the pipeline overlapped.
    """
    sublane = _sublane_for_itemsize(in_dsize)
    cap = _vmem_capacity_bytes()
    target_block_bytes = (8 << 20) if cap >= (100 << 20) else (4 << 20)

    # Per-row VMEM cost: 2x double-buffered input + output pipeline buffers,
    # plus ~3 full f32 temporaries inside the kernel body (x_f32, centered, y).
    per_row_pipeline = 2 * H * (in_dsize + out_dsize)
    per_row_temps = 3 * H * 4
    budget = cap // 2  # headroom for compiler scratch / params
    max_tile = max(sublane,
                   (budget // (per_row_pipeline + per_row_temps)) // sublane * sublane)

    tile = max(sublane, (target_block_bytes // (H * in_dsize)) // sublane * sublane)
    tile = min(tile, max_tile)

    # Keep at least ~8 grid steps when there is enough work (>= 4 per core on
    # v7x's 2 TCs), so DMA prefetch/writeback overlap compute. No-op when R is
    # already much larger than the block.
    min_steps = 8
    if R >= min_steps * sublane:
        tile = min(tile, _round_up(pl.cdiv(R, min_steps), sublane))

    # Never allocate a block taller than the (rounded-up) array itself.
    tile = min(tile, _round_up(R, sublane))
    return max(sublane, tile)


def layer_norm(x, weight, bias=None, *, row_tile=None):
    """Pallas LayerNorm over the last dim; matches F.layer_norm(x, (H,), w, b, 1e-5).

    Note: for best store throughput the last dim H should be a multiple of 128
    (lane-dense); DeepSeekV2's real hidden sizes satisfy this. Sub-128 H still
    works but lowers to masked partial stores.
    """
    orig_shape = x.shape
    H = orig_shape[-1]
    x2 = x.reshape(-1, H)
    R = x2.shape[0]

    in_dsize = x2.dtype.itemsize
    out_dsize = in_dsize
    sublane = _sublane_for_itemsize(in_dsize)

    if row_tile is not None:
        tile = max(sublane, (int(row_tile) // sublane) * sublane)
    else:
        tile = _pick_row_tile(R, H, in_dsize, out_dsize)

    # Ragged rows: no host-side pad/slice. Pallas masks the partial last block's
    # writes; the over-read tail rows are normalized independently and discarded.
    grid = (pl.cdiv(R, tile),)

    # VMEM limit: double-buffered input + output tiles, in-kernel f32 temps,
    # parameter vectors, plus headroom.
    needed = (2 * tile * H * (in_dsize + out_dsize)  # pipeline buffers (in+out, 2x)
              + 3 * tile * H * 4                      # f32 temporaries in the body
              + 4 * H * 4)                            # weight/bias vectors
    vmem_cap = _vmem_capacity_bytes()
    vmem_limit = int(min(vmem_cap * 3 // 4, max(needed + (8 << 20), 32 << 20)))

    # TODO(synk): if a v7x profile shows a single-core schedule, switch the row
    # axis to pltpu.CORE_PARALLEL (or an explicit core_map split).
    compiler_params = pltpu.CompilerParams(
        dimension_semantics=("parallel",),
        vmem_limit_bytes=vmem_limit,
    )

    row_spec = pl.BlockSpec((tile, H), lambda i: (i, 0))
    vec_spec = pl.BlockSpec((1, H), lambda i: (0, 0))

    w2 = weight.reshape(1, H)

    if bias is None:
        out = pl.pallas_call(
            _layernorm_nobias_kernel,
            out_shape=jax.ShapeDtypeStruct((R, H), x.dtype),
            grid_spec=pltpu.PrefetchScalarGridSpec(
                num_scalar_prefetch=0,
                grid=grid,
                in_specs=[row_spec, vec_spec],
                out_specs=row_spec,
            ),
            compiler_params=compiler_params,
        )(x2, w2)
    else:
        b2 = bias.reshape(1, H)
        out = pl.pallas_call(
            _layernorm_bias_kernel,
            out_shape=jax.ShapeDtypeStruct((R, H), x.dtype),
            grid_spec=pltpu.PrefetchScalarGridSpec(
                num_scalar_prefetch=0,
                grid=grid,
                in_specs=[row_spec, vec_spec, vec_spec],
                out_specs=row_spec,
            ),
            compiler_params=compiler_params,
        )(x2, w2, b2)

    return out.reshape(orig_shape)


class LayerNorm:
    """JAX/Pallas port of the PyTorch LayerNorm (optional bias)."""

    def __init__(self, ndim, bias):
        self.weight = jnp.ones((ndim,), dtype=jnp.float32)
        self.bias = jnp.zeros((ndim,), dtype=jnp.float32) if bias else None

    def __call__(self, x):
        return layer_norm(x, self.weight, self.bias)


# ---------------------------------------------------------------------------
# Demo / correctness check
# ---------------------------------------------------------------------------
def _ref_layer_norm(x, w, b):
    xf = x.astype(jnp.float32)
    mean = jnp.mean(xf, axis=-1, keepdims=True)
    var = jnp.mean((xf - mean) ** 2, axis=-1, keepdims=True)
    y = (xf - mean) / jnp.sqrt(var + EPS) * w
    if b is not None:
        y = y + b
    return y.astype(x.dtype)


if __name__ == "__main__":
    key = jax.random.PRNGKey(0)
    batch, seq, hidden = 2, 8, 128  # lane-dense hidden (multiple of 128)

    kx, kw, kb, kx2 = jax.random.split(key, 4)
    x = jax.random.normal(kx, (batch, seq, hidden), dtype=jnp.float32)

    weight = 1.0 + 0.1 * jax.random.normal(kw, (hidden,), dtype=jnp.float32)
    bias = 0.05 * jax.random.normal(kb, (hidden,), dtype=jnp.float32)

    # 1) LayerNorm with bias.
    ln = LayerNorm(hidden, bias=True)
    ln.weight, ln.bias = weight, bias
    out = jax.block_until_ready(ln(x))
    ref = _ref_layer_norm(x, weight, bias)
    assert out.shape == x.shape
    assert jnp.max(jnp.abs(out - ref)) < 1e-5

    # 2) No-bias variant (dedicated kernel, no zeros DMA).
    ln_nb = LayerNorm(hidden, bias=False)
    ln_nb.weight = weight
    out_nb = jax.block_until_ready(ln_nb(x))
    ref_nb = _ref_layer_norm(x, weight, None)
    assert jnp.max(jnp.abs(out_nb - ref_nb)) < 1e-5

    # 3) Ragged row count (R=15 -> partial last block handled in-kernel, no pad/slice).
    x_ragged = jax.random.normal(kx2, (3, 5, hidden), dtype=jnp.float32)
    out_rag = jax.block_until_ready(layer_norm(x_ragged, weight, bias))
    ref_rag = _ref_layer_norm(x_ragged, weight, bias)
    assert out_rag.shape == x_ragged.shape
    assert jnp.max(jnp.abs(out_rag - ref_rag)) < 1e-5

    # 4) Forced multi-step grid (exercise pipelining + row_tile override).
    out_tiled = jax.block_until_ready(layer_norm(x, weight, bias, row_tile=8))
    assert jnp.max(jnp.abs(out_tiled - ref)) < 1e-5

    # 5) bf16 I/O (f32 accumulation inside the kernel, 16-row sublane packing).
    x_bf16 = x.astype(jnp.bfloat16)
    out_bf16 = jax.block_until_ready(layer_norm(x_bf16, weight, bias))
    ref_bf16 = _ref_layer_norm(x_bf16, weight, bias)
    assert out_bf16.dtype == jnp.bfloat16
    assert jnp.max(jnp.abs(out_bf16.astype(jnp.float32)
                           - ref_bf16.astype(jnp.float32))) < 3e-2

    print("KERNEL_OK")
</pallas_src>

<mosaic_0001>
module attributes {stable_mosaic.version = 11 : i64} {
  func.func @_layernorm_bias_kernel(%arg0: i32, %arg1: memref<16x128xf32, #tpu.memory_space<vmem>>, %arg2: memref<1x128xf32, #tpu.memory_space<vmem>>, %arg3: memref<1x128xf32, #tpu.memory_space<vmem>>, %arg4: memref<16x128xf32, #tpu.memory_space<vmem>>) attributes {dimension_semantics = [#tpu.dimension_semantics<parallel>], iteration_bounds = array<i64: 1>, scalar_prefetch = 0 : i64, scratch_operands = 0 : i64, tpu.core_type = #tpu.core_type<tc>, window_params = [{transform_indices = @transform_0, window_bounds = array<i64: 16, 128>}, {pipeline_mode = #tpu.pipeline_mode<synchronous>, transform_indices = @transform_1, window_bounds = array<i64: 1, 128>}, {pipeline_mode = #tpu.pipeline_mode<synchronous>, transform_indices = @transform_2, window_bounds = array<i64: 1, 128>}, {transform_indices = @transform_3, window_bounds = array<i64: 16, 128>}]} {
    %c0 = arith.constant 0 : index
    %c0_0 = arith.constant 0 : index
    %0 = vector.load %arg1[%c0, %c0_0] : memref<16x128xf32, #tpu.memory_space<vmem>>, vector<16x128xf32>
    %cst = arith.constant dense<0.000000e+00> : vector<16xf32>
    %1 = vector.multi_reduction <add>, %0, %cst [1] : vector<16x128xf32> to vector<16xf32>
    %2 = vector.shape_cast %1 : vector<16xf32> to vector<16x1xf32>
    %cst_1 = arith.constant 7.812500e-03 : f32
    %3 = vector.broadcast %cst_1 : f32 to vector<16x1xf32>
    %4 = arith.mulf %2, %3 : vector<16x1xf32>
    %5 = vector.broadcast %4 : vector<16x1xf32> to vector<16x128xf32>
    %6 = arith.subf %0, %5 : vector<16x128xf32>
    %7 = arith.mulf %6, %6 : vector<16x128xf32>
    %cst_2 = arith.constant dense<0.000000e+00> : vector<16xf32>
    %8 = vector.multi_reduction <add>, %7, %cst_2 [1] : vector<16x128xf32> to vector<16xf32>
    %9 = vector.shape_cast %8 : vector<16xf32> to vector<16x1xf32>
    %cst_3 = arith.constant 7.812500e-03 : f32
    %10 = vector.broadcast %cst_3 : f32 to vector<16x1xf32>
    %11 = arith.mulf %9, %10 : vector<16x1xf32>
    %cst_4 = arith.constant 9.99999974E-6 : f32
    %12 = vector.broadcast %cst_4 : f32 to vector<16x1xf32>
    %13 = arith.addf %11, %12 : vector<16x1xf32>
    %14 = math.rsqrt %13 : vector<16x1xf32>
    %15 = vector.broadcast %14 : vector<16x1xf32> to vector<16x128xf32>
    %16 = arith.mulf %6, %15 : vector<16x128xf32>
    %c0_5 = arith.constant 0 : index
    %c0_6 = arith.constant 0 : index
    %17 = vector.load %arg2[%c0_5, %c0_6] : memref<1x128xf32, #tpu.memory_space<vmem>>, vector<1x128xf32>
    %18 = vector.broadcast %17 : vector<1x128xf32> to vector<16x128xf32>
    %19 = arith.mulf %16, %18 : vector<16x128xf32>
    %c0_7 = arith.constant 0 : index
    %c0_8 = arith.constant 0 : index
    %20 = vector.load %arg3[%c0_7, %c0_8] : memref<1x128xf32, #tpu.memory_space<vmem>>, vector<1x128xf32>
    %21 = vector.broadcast %20 : vector<1x128xf32> to vector<16x128xf32>
    %22 = arith.addf %19, %21 : vector<16x128xf32>
    %c0_9 = arith.constant 0 : index
    %c0_10 = arith.constant 0 : index
    %23 = vector.load %arg4[%c0_9, %c0_10] : memref<16x128xf32, #tpu.memory_space<vmem>>, vector<16x128xf32>
    tpu.vector_store %arg4[%c0_9, %c0_10], %22 {strides = array<i32>} : memref<16x128xf32, #tpu.memory_space<vmem>>, vector<16x128xf32>,
    return
  }
  func.func @transform_0(%arg0: i32) -> (i32, i32) {
    %c0_i32 = arith.constant 0 : i32
    %c0_i32_0 = arith.constant 0 : i32
    return %arg0, %c0_i32 : i32, i32
  }
  func.func @transform_1(%arg0: i32) -> (i32, i32) {
    %c0_i32 = arith.constant 0 : i32
    %c0_i32_0 = arith.constant 0 : i32
    %c0_i32_1 = arith.constant 0 : i32
    return %c0_i32, %c0_i32_0 : i32, i32
  }
  func.func @transform_2(%arg0: i32) -> (i32, i32) {
    %c0_i32 = arith.constant 0 : i32
    %c0_i32_0 = arith.constant 0 : i32
    %c0_i32_1 = arith.constant 0 : i32
    return %c0_i32, %c0_i32_0 : i32, i32
  }
  func.func @transform_3(%arg0: i32) -> (i32, i32) {
    %c0_i32 = arith.constant 0 : i32
    %c0_i32_0 = arith.constant 0 : i32
    return %arg0, %c0_i32 : i32, i32
  }
}

</mosaic_0001>

<bundles_post_ra>
// kernel: tpu_custom_call.1
= control target key start
LH: loop header
LB: loop body
LE: loop exit
PB: predicated region body
PF: predicated region fallthrough
CT: control target
= control target key end

     0   :  { %8 = vsyncpa [#allocation3], 0  ;;  %s253_s0 = inlined_call_operand.hbm [shape: f32[16,128], index: 0, kind: input, shape index: {}]   ;;  %s254_s1 = inlined_call_operand.hbm [shape: f32[1,128], index: 1, kind: input, shape index: {}]   ;;  %s255_s2 = inlined_call_operand.vmem [shape: f32[1,128], index: 2, kind: input, shape index: {}]   ;;  %s256_s3 = inlined_call_operand.hbm [shape: f32[16,128], index: 3, kind: output, shape index: {}]  }
   0x1   :  { %9 = vsyncpa [#allocation6], 0 }
   0x2   :  { %10 = vsyncpa [#allocation4], 0  ;;  %s15_s14 = sshll.u32 %s253_s0, 4  ;;  %s210_s15 = smov [#allocation2]   ;;  %s16_s14 = int_to_ptr.hbm [resolvable:$true] %s15_s14 }
   0x3   :  { %s17_s16 = sshll.u32 %s210_s15, 4  ;;  %s29_s19 = sshll.u32 %s254_s1, 4  ;;  %s18_s16 = int_to_ptr.vmem [resolvable:$true] %s17_s16  ;;  %s30_s19 = int_to_ptr.hbm [resolvable:$true] %s29_s19 }
   0x4   :  { %s211_s20 = smov 128   ;;  %s212_s21 = smov 8  }
   0x5   :  { %23 = dma.hbm_to_vmem [thread:$0]  %s16_s14, 256, %s18_s16, [#allocation3], %s211_s20, %s211_s20, %s212_s21  }
   0x6   :  { %s213_s22 = smov [#allocation5]  }
   0x7   :  { %s31_s23 = sshll.u32 %s213_s22, 4  ;;  %s32_s23 = int_to_ptr.vmem [resolvable:$true] %s31_s23 }
   0x8   :  { %34 = dma.hbm_to_vmem [thread:$0]  %s30_s19, 16, %s32_s23, [#allocation6]  }
   0x9   :  { %204 = dma.done.wait [#allocation3], 256  }
   0xa   :  { %205 = vsyncadd [#allocation3], 4294967040 }
   0xb   :  { %206 = dma.done.wait [#allocation6], 16  }
   0xc   :  { %207 = vsyncadd [#allocation6], 4294967280  ;;  %v45_v0 = vld [vmem:[#allocation2] sm:$0xff]  ;;  %v46_v1 = vld [vmem:[#allocation2 + $0x8] sm:$0xff]  ;;  %s214_s24 = smov [#allocation7]   ;;  %s107_s28 = sshll.u32 %s256_s3, 4  ;;  %s108_s28 = int_to_ptr.hbm [resolvable:$true] %s107_s28 }
   0xd   :  { %47 = vadd.xlane.f32.xlu0 %v45_v0  ;;  %v126_v24 = vld [vmem:[#allocation5] ss:$0 sm:$0xff]  ;;  %v127_v28 = vld [vmem:[%s255_s2] ss:$0 sm:$0xff]  ;;  %s105_s25 = sshll.u32 %s214_s24, 4  ;;  %s106_s25 = int_to_ptr.vmem [resolvable:$true] %s105_s25 }
  0x15   :  { %49 = vadd.xlane.f32.xlu0 %v46_v1 }
  0x80   :  { %v48_v2 = vpop.xlane.xlu0 %47 }
  0x81   :  { %v51_v3 = vmul.f32 0.0078125, %v48_v2 }
  0x83   :  { %v53_v4 = vsub.f32 %v45_v0, %v51_v3 }
  0x85   :  { %v55_v5 = vmul.f32 %v53_v4, %v53_v4 }
  0x87   :  { %57 = vadd.xlane.f32.xlu1 %v55_v5 }
  0x88   :  { %v50_v6 = vpop.xlane.xlu0 %49 }
  0x89   :  { %v52_v7 = vmul.f32 0.0078125, %v50_v6 }
  0x8b   :  { %v54_v8 = vsub.f32 %v46_v1, %v52_v7 }
  0x8d   :  { %v56_v9 = vmul.f32 %v54_v8, %v54_v8 }
  0x8f   :  { %59 = vadd.xlane.f32.xlu1 %v56_v9 }
  0xfa   :  { %v58_v10 = vpop.xlane.xlu1 %57 }
  0xfb   :  { %v61_v11 = vmul.f32 0.0078125, %v58_v10 }
  0xfd   :  { %v63_v12 = vadd.f32 1e-05, %v61_v11 }
  0xff   :  { %128 = vrsqrt.f32 %v63_v12  ;;  %vm71_vm1 = vweird.f32 %v63_v12 }
 0x102   :  { %v60_v13 = vpop.xlane.xlu1 %59 }
 0x103   :  { %v62_v14 = vmul.f32 0.0078125, %v60_v13 }
 0x105   :  { %v129_v15 = vpop.eup %128  ;;  %v64_v16 = vadd.f32 1e-05, %v62_v14 }
 0x106   :  { %v66_v17 = vmul.f32 %v129_v15, %v63_v12  ;;  %vm72_vm0 = vweird.f32 %v129_v15 }
 0x107   :  { %130 = vrsqrt.f32 %v64_v16  ;;  %vm73_vm2 = vmor %vm71_vm1, %vm72_vm0  ;;  %vm81_vm4 = vweird.f32 %v64_v16 }
 0x108   :  { %v67_v18 = vmul.f32 %v129_v15, %v66_v17 }
 0x10a   :  { %v68_v19 = vmul.f32 0.5, %v67_v18 }
 0x10c   :  { %v69_v20 = vsub.f32 1.5, %v68_v19 }
 0x10d   :  { %v131_v21 = vpop.eup %130 }
 0x10e   :  { %v70_v22 = vmul.f32 %v129_v15, %v69_v20  ;;  %v76_v23 = vmul.f32 %v131_v21, %v64_v16  ;;  %vm82_vm3 = vweird.f32 %v131_v21 }
 0x10f   :  { %vm83_vm5 = vmor %vm81_vm4, %vm82_vm3 }
 0x110   :  { %v74_v25 = vsel %vm73_vm2, %v129_v15, %v70_v22  ;;  %v77_v26 = vmul.f32 %v131_v21, %v76_v23 }
 0x111   :  { %v85_v27 = vmul.f32 %v74_v25, %v53_v4 }
 0x112   :  { %v78_v29 = vmul.f32 0.5, %v77_v26 }
 0x113   :  { %v91_v30 = vmul.f32 %v126_v24, %v85_v27 }
 0x114   :  { %v79_v31 = vsub.f32 1.5, %v78_v29 }
 0x115   :  { %v97_v32 = vadd.f32 %v127_v28, %v91_v30 }
 0x116   :  { %v80_v33 = vmul.f32 %v131_v21, %v79_v31 }
 0x117   :  { %99 = vst [vmem:[#allocation7] sm:$0xff] %v97_v32 }
 0x118   :  { %v84_v34 = vsel %vm83_vm5, %v131_v21, %v80_v33 }
 0x119   :  { %v86_v35 = vmul.f32 %v84_v34, %v54_v8 }
 0x11b   :  { %v92_v36 = vmul.f32 %v126_v24, %v86_v35 }
 0x11d   :  { %v98_v37 = vadd.f32 %v127_v28, %v92_v36 }
 0x11f   :  { %100 = vst [vmem:[#allocation7 + $0x8] sm:$0xff] %v98_v37 }
 0x120   :  { %113 = dma.vmem_to_hbm [thread:$0]  %s106_s25, 256, %s108_s28, [#allocation4], %s211_s20, %s211_s20, %s212_s21  }
 0x121   :  { %208 = dma.done.wait [#allocation4], 256  }
 0x122   :  { %209 = vsyncadd [#allocation4], 4294967040 }
 0x123   :  { %118 = vsyncpa [#allocation3], 1 }
 0x124   :  { %119 = vsyncpa [#allocation6], 1 }
 0x125   :  { %120 = vsyncpa [#allocation4], 1 }

</bundles_post_ra>
